<compile_context>
chip_gen: v7x
topology: tpu7x:2x2x1
jax: 0.10.0
libtpu: 0.0.40
codegen_flags: <defaults>
</compile_context>

<pallas_src>
import functools

import jax
import jax.numpy as jnp
from jax.experimental import pallas as pl
from jax.experimental.pallas import tpu as pltpu

EULER_GAMMA = 0.5772156649015329


def _softplus(x):
    # Numerically stable softplus == torch.nn.Softplus(beta=1).
    return jnp.maximum(x, 0.0) + jnp.log1p(jnp.exp(-jnp.abs(x)))


def _logaddexp(a, b):
    # Stable elementwise logsumexp of a pair == torch.logsumexp(stack([a, b]), 0).
    m = jnp.maximum(a, b)
    return m + jnp.log1p(jnp.exp(-jnp.abs(a - b)))


def _vbcbox_kernel(g_ref, out_ref, *, t, inv_t, vt, inv_vt, sp_const):
    # g_ref block: (6, dim, TB) with leading-axis rows
    #   [embs1[idx1], embs2[idx1], bins[idx1], embs1[idx2], embs2[idx2], bins[idx2]]
    # Batch is the lane (minor) axis; leading-axis indexing is free (distinct
    # sublane/lane tiles), so no in-kernel lane slicing is needed.
    c1, o1, b1 = g_ref[0], g_ref[1], g_ref[2]
    c2, o2, b2 = g_ref[3], g_ref[4], g_ref[5]

    w1 = _softplus(o1) * 0.5
    min1 = c1 - w1
    max1 = c1 + w1

    w2 = _softplus(o2) * 0.5
    min2 = c2 - w2
    max2 = c2 + w2

    bin_vec = jax.nn.sigmoid(b1) * jax.nn.sigmoid(b2)

    # Gumbel intersection (temperature t); divides replaced by reciprocal muls.
    meet_min = t * _logaddexp(min1 * inv_t, min2 * inv_t)
    meet_max = -t * _logaddexp(-max1 * inv_t, -max2 * inv_t)
    meet_min = jnp.maximum(meet_min, jnp.maximum(min1, min2))
    meet_max = jnp.minimum(meet_max, jnp.minimum(max1, max2))

    def log_volume(z, Z):
        side = vt * _softplus((Z - z - sp_const) * inv_vt) + 1e-20
        # Reduce over dim (sublane axis) -> lane-dense (1, TB) result.
        return jnp.sum(jnp.log(side) * bin_vec, axis=0, keepdims=True)

    out_ref[...] = log_volume(meet_min, meet_max) - log_volume(min2, max2)


def vbcbox_forward(idx1, idx2, embs1_w, embs2_w, bins_w, emb1=None, emb2=None, *,
                   volume_temp=1.0, intersection_temp=0.01, tb=128):
    """idx1, idx2: int (B,); tables: float32 (N, dim). Returns logp (B,) float32.

    `emb1`/`emb2` mirror the unused arguments of the PyTorch forward and are ignored.
    """
    del emb1, emb2
    assert tb % 128 == 0, "tb must be a multiple of 128 for a lane-dense output"
    B = int(idx1.shape[0])
    N, dim = embs1_w.shape

    # nn.Embedding raises on OOB indices; clamp so a bad index can never fault.
    idx1 = jnp.clip(idx1.astype(jnp.int32), 0, N - 1)
    idx2 = jnp.clip(idx2.astype(jnp.int32), 0, N - 1)

    num_tiles = pl.cdiv(B, tb)
    b_pad = num_tiles * tb
    if b_pad != B:
        pad = b_pad - B
        idx1 = jnp.concatenate([idx1, jnp.zeros((pad,), jnp.int32)])
        idx2 = jnp.concatenate([idx2, jnp.zeros((pad,), jnp.int32)])

    # Fuse the three tables and gather once per index set; then put the batch on
    # the minor (lane) axis.  All O(B*dim) wrapper work; the full tables never
    # need to be VMEM-resident.
    table = jnp.stack([embs1_w, embs2_w, bins_w], axis=0).astype(jnp.float32)  # (3, N, dim)
    rows1 = jnp.take(table, idx1, axis=1)            # (3, b_pad, dim)
    rows2 = jnp.take(table, idx2, axis=1)            # (3, b_pad, dim)
    g = jnp.concatenate([rows1, rows2], axis=0)      # (6, b_pad, dim)
    g = jnp.transpose(g, (0, 2, 1))                  # (6, dim, b_pad)

    kernel = functools.partial(
        _vbcbox_kernel,
        t=float(intersection_temp),
        inv_t=float(1.0 / intersection_temp),
        vt=float(volume_temp),
        inv_vt=float(1.0 / volume_temp),
        sp_const=float(2.0 * intersection_temp * EULER_GAMMA),
    )

    cost = pl.CostEstimate(
        flops=int(60 * b_pad * dim),
        transcendentals=int(16 * b_pad * dim),
        bytes_accessed=int(6 * b_pad * dim * 4 + b_pad * 4),
    )

    out = pl.pallas_call(
        kernel,
        out_shape=jax.ShapeDtypeStruct((1, b_pad), jnp.float32),
        grid_spec=pl.GridSpec(
            grid=(num_tiles,),
            in_specs=[pl.BlockSpec((6, dim, tb), lambda i: (0, 0, i))],
            out_specs=pl.BlockSpec((1, tb), lambda i: (0, i)),
        ),
        compiler_params=pltpu.CompilerParams(
            dimension_semantics=("parallel",)),
        cost_estimate=cost,
    )(g)

    return out[0, :B]


def vbcbox_reference(idx1, idx2, embs1_w, embs2_w, bins_w, *,
                     volume_temp=1.0, intersection_temp=0.01):
    """Pure-JAX reference matching the PyTorch forward."""
    sp = lambda x: jnp.logaddexp(x, 0.0)
    t = intersection_temp
    vt = volume_temp
    sp_const = 2.0 * intersection_temp * EULER_GAMMA

    c1 = embs1_w[idx1]
    w1 = sp(embs2_w[idx1]) / 2.0
    min1, max1 = c1 - w1, c1 + w1
    c2 = embs1_w[idx2]
    w2 = sp(embs2_w[idx2]) / 2.0
    min2, max2 = c2 - w2, c2 + w2
    bin_vec = jax.nn.sigmoid(bins_w[idx1]) * jax.nn.sigmoid(bins_w[idx2])

    meet_min = t * jnp.logaddexp(min1 / t, min2 / t)
    meet_max = -t * jnp.logaddexp(-max1 / t, -max2 / t)
    meet_min = jnp.maximum(meet_min, jnp.maximum(min1, min2))
    meet_max = jnp.minimum(meet_max, jnp.minimum(max1, max2))

    def log_volume(z, Z):
        return jnp.sum(jnp.log(vt * sp((Z - z - sp_const) / vt) + 1e-20) * bin_vec,
                       axis=-1)

    return log_volume(meet_min, meet_max) - log_volume(min2, max2)


if __name__ == "__main__":
    # Small deterministic setup consistent with VBCBox(dim, N).
    N, dim = 100, 32

    key = jax.random.PRNGKey(0)
    k1, k2, k3, k4 = jax.random.split(key, 4)

    # nn.Embedding default init is N(0, 1).
    embs1_w = jax.random.normal(k1, (N, dim), dtype=jnp.float32)
    embs2_w = jax.random.normal(k2, (N, dim), dtype=jnp.float32)
    bins_w = jax.random.normal(k3, (N, dim), dtype=jnp.float32)

    # B=16 exercises padding (one 128-wide tile); B=300 exercises multiple tiles.
    for B in (16, 300):
        kb = jax.random.fold_in(k4, B)
        ka, kc = jax.random.split(kb)
        idx1 = jax.random.randint(ka, (B,), 0, N, dtype=jnp.int32)
        idx2 = jax.random.randint(kc, (B,), 0, N, dtype=jnp.int32)

        out = vbcbox_forward(idx1, idx2, embs1_w, embs2_w, bins_w)
        out = jax.block_until_ready(out)

        ref = vbcbox_reference(idx1, idx2, embs1_w, embs2_w, bins_w)
        assert out.shape == (B,)
        assert jnp.allclose(out, ref, rtol=1e-4, atol=1e-4), (B, out, ref)

    print("KERNEL_OK")
</pallas_src>

<mosaic_0001>
module attributes {stable_mosaic.version = 11 : i64} {
  func.func @_vbcbox_kernel(%arg0: i32, %arg1: memref<6x32x128xf32, #tpu.memory_space<vmem>>, %arg2: memref<1x128xf32, #tpu.memory_space<vmem>>) attributes {dimension_semantics = [#tpu.dimension_semantics<parallel>], iteration_bounds = array<i64: 1>, scalar_prefetch = 0 : i64, scratch_operands = 0 : i64, tpu.core_type = #tpu.core_type<tc>, window_params = [{transform_indices = @transform_0, window_bounds = array<i64: 6, 32, 128>}, {transform_indices = @transform_1, window_bounds = array<i64: 1, 128>}]} {
    %c0 = arith.constant 0 : index
    %c0_0 = arith.constant 0 : index
    %c0_1 = arith.constant 0 : index
    %0 = vector.load %arg1[%c0, %c0_0, %c0_1] : memref<6x32x128xf32, #tpu.memory_space<vmem>>, vector<1x32x128xf32>
    %1 = vector.shape_cast %0 : vector<1x32x128xf32> to vector<32x128xf32>
    %c1 = arith.constant 1 : index
    %c0_2 = arith.constant 0 : index
    %c0_3 = arith.constant 0 : index
    %2 = vector.load %arg1[%c1, %c0_2, %c0_3] : memref<6x32x128xf32, #tpu.memory_space<vmem>>, vector<1x32x128xf32>
    %3 = vector.shape_cast %2 : vector<1x32x128xf32> to vector<32x128xf32>
    %c2 = arith.constant 2 : index
    %c0_4 = arith.constant 0 : index
    %c0_5 = arith.constant 0 : index
    %4 = vector.load %arg1[%c2, %c0_4, %c0_5] : memref<6x32x128xf32, #tpu.memory_space<vmem>>, vector<1x32x128xf32>
    %5 = vector.shape_cast %4 : vector<1x32x128xf32> to vector<32x128xf32>
    %c3 = arith.constant 3 : index
    %c0_6 = arith.constant 0 : index
    %c0_7 = arith.constant 0 : index
    %6 = vector.load %arg1[%c3, %c0_6, %c0_7] : memref<6x32x128xf32, #tpu.memory_space<vmem>>, vector<1x32x128xf32>
    %7 = vector.shape_cast %6 : vector<1x32x128xf32> to vector<32x128xf32>
    %c4 = arith.constant 4 : index
    %c0_8 = arith.constant 0 : index
    %c0_9 = arith.constant 0 : index
    %8 = vector.load %arg1[%c4, %c0_8, %c0_9] : memref<6x32x128xf32, #tpu.memory_space<vmem>>, vector<1x32x128xf32>
    %9 = vector.shape_cast %8 : vector<1x32x128xf32> to vector<32x128xf32>
    %c5 = arith.constant 5 : index
    %c0_10 = arith.constant 0 : index
    %c0_11 = arith.constant 0 : index
    %10 = vector.load %arg1[%c5, %c0_10, %c0_11] : memref<6x32x128xf32, #tpu.memory_space<vmem>>, vector<1x32x128xf32>
    %11 = vector.shape_cast %10 : vector<1x32x128xf32> to vector<32x128xf32>
    %cst = arith.constant 0.000000e+00 : f32
    %12 = vector.broadcast %cst : f32 to vector<32x128xf32>
    %13 = arith.maximumf %3, %12 : vector<32x128xf32>
    %14 = math.absf %3 : vector<32x128xf32>
    %cst_12 = arith.constant 0.000000e+00 : f32
    %15 = vector.broadcast %cst_12 : f32 to vector<32x128xf32>
    %16 = arith.subf %15, %14 : vector<32x128xf32>
    %17 = math.exp %16 : vector<32x128xf32>
    %18 = math.log1p %17 : vector<32x128xf32>
    %19 = arith.addf %13, %18 : vector<32x128xf32>
    %cst_13 = arith.constant 5.000000e-01 : f32
    %20 = vector.broadcast %cst_13 : f32 to vector<32x128xf32>
    %21 = arith.mulf %19, %20 : vector<32x128xf32>
    %22 = arith.subf %1, %21 : vector<32x128xf32>
    %23 = arith.addf %1, %21 : vector<32x128xf32>
    %cst_14 = arith.constant 0.000000e+00 : f32
    %24 = vector.broadcast %cst_14 : f32 to vector<32x128xf32>
    %25 = arith.maximumf %9, %24 : vector<32x128xf32>
    %26 = math.absf %9 : vector<32x128xf32>
    %cst_15 = arith.constant 0.000000e+00 : f32
    %27 = vector.broadcast %cst_15 : f32 to vector<32x128xf32>
    %28 = arith.subf %27, %26 : vector<32x128xf32>
    %29 = math.exp %28 : vector<32x128xf32>
    %30 = math.log1p %29 : vector<32x128xf32>
    %31 = arith.addf %25, %30 : vector<32x128xf32>
    %cst_16 = arith.constant 5.000000e-01 : f32
    %32 = vector.broadcast %cst_16 : f32 to vector<32x128xf32>
    %33 = arith.mulf %31, %32 : vector<32x128xf32>
    %34 = arith.subf %7, %33 : vector<32x128xf32>
    %35 = arith.addf %7, %33 : vector<32x128xf32>
    %36 = arith.negf %5 : vector<32x128xf32>
    %37 = math.exp %36 : vector<32x128xf32>
    %cst_17 = arith.constant 1.000000e+00 : f32
    %38 = vector.broadcast %cst_17 : f32 to vector<32x128xf32>
    %39 = arith.addf %38, %37 : vector<32x128xf32>
    %40 = arith.divf %38, %39 : vector<32x128xf32>
    %41 = arith.negf %11 : vector<32x128xf32>
    %42 = math.exp %41 : vector<32x128xf32>
    %cst_18 = arith.constant 1.000000e+00 : f32
    %43 = vector.broadcast %cst_18 : f32 to vector<32x128xf32>
    %44 = arith.addf %43, %42 : vector<32x128xf32>
    %45 = arith.divf %43, %44 : vector<32x128xf32>
    %46 = arith.mulf %40, %45 : vector<32x128xf32>
    %cst_19 = arith.constant 1.000000e+02 : f32
    %47 = vector.broadcast %cst_19 : f32 to vector<32x128xf32>
    %48 = arith.mulf %22, %47 : vector<32x128xf32>
    %cst_20 = arith.constant 1.000000e+02 : f32
    %49 = vector.broadcast %cst_20 : f32 to vector<32x128xf32>
    %50 = arith.mulf %34, %49 : vector<32x128xf32>
    %51 = arith.maximumf %48, %50 : vector<32x128xf32>
    %52 = arith.subf %48, %50 : vector<32x128xf32>
    %53 = math.absf %52 : vector<32x128xf32>
    %cst_21 = arith.constant 0.000000e+00 : f32
    %54 = vector.broadcast %cst_21 : f32 to vector<32x128xf32>
    %55 = arith.subf %54, %53 : vector<32x128xf32>
    %56 = math.exp %55 : vector<32x128xf32>
    %57 = math.log1p %56 : vector<32x128xf32>
    %58 = arith.addf %51, %57 : vector<32x128xf32>
    %cst_22 = arith.constant 0.00999999977 : f32
    %59 = vector.broadcast %cst_22 : f32 to vector<32x128xf32>
    %60 = arith.mulf %59, %58 : vector<32x128xf32>
    %cst_23 = arith.constant 0.000000e+00 : f32
    %61 = vector.broadcast %cst_23 : f32 to vector<32x128xf32>
    %62 = arith.subf %61, %23 : vector<32x128xf32>
    %cst_24 = arith.constant 1.000000e+02 : f32
    %63 = vector.broadcast %cst_24 : f32 to vector<32x128xf32>
    %64 = arith.mulf %62, %63 : vector<32x128xf32>
    %cst_25 = arith.constant 0.000000e+00 : f32
    %65 = vector.broadcast %cst_25 : f32 to vector<32x128xf32>
    %66 = arith.subf %65, %35 : vector<32x128xf32>
    %cst_26 = arith.constant 1.000000e+02 : f32
    %67 = vector.broadcast %cst_26 : f32 to vector<32x128xf32>
    %68 = arith.mulf %66, %67 : vector<32x128xf32>
    %69 = arith.maximumf %64, %68 : vector<32x128xf32>
    %70 = arith.subf %64, %68 : vector<32x128xf32>
    %71 = math.absf %70 : vector<32x128xf32>
    %cst_27 = arith.constant 0.000000e+00 : f32
    %72 = vector.broadcast %cst_27 : f32 to vector<32x128xf32>
    %73 = arith.subf %72, %71 : vector<32x128xf32>
    %74 = math.exp %73 : vector<32x128xf32>
    %75 = math.log1p %74 : vector<32x128xf32>
    %76 = arith.addf %69, %75 : vector<32x128xf32>
    %cst_28 = arith.constant -0.00999999977 : f32
    %77 = vector.broadcast %cst_28 : f32 to vector<32x128xf32>
    %78 = arith.mulf %77, %76 : vector<32x128xf32>
    %79 = arith.maximumf %22, %34 : vector<32x128xf32>
    %80 = arith.maximumf %60, %79 : vector<32x128xf32>
    %81 = arith.minimumf %23, %35 : vector<32x128xf32>
    %82 = arith.minimumf %78, %81 : vector<32x128xf32>
    %83 = arith.subf %82, %80 : vector<32x128xf32>
    %cst_29 = arith.constant 0.0115443133 : f32
    %84 = vector.broadcast %cst_29 : f32 to vector<32x128xf32>
    %85 = arith.subf %83, %84 : vector<32x128xf32>
    %cst_30 = arith.constant 1.000000e+00 : f32
    %86 = vector.broadcast %cst_30 : f32 to vector<32x128xf32>
    %87 = arith.mulf %85, %86 : vector<32x128xf32>
    %cst_31 = arith.constant 0.000000e+00 : f32
    %88 = vector.broadcast %cst_31 : f32 to vector<32x128xf32>
    %89 = arith.maximumf %87, %88 : vector<32x128xf32>
    %90 = math.absf %87 : vector<32x128xf32>
    %cst_32 = arith.constant 0.000000e+00 : f32
    %91 = vector.broadcast %cst_32 : f32 to vector<32x128xf32>
    %92 = arith.subf %91, %90 : vector<32x128xf32>
    %93 = math.exp %92 : vector<32x128xf32>
    %94 = math.log1p %93 : vector<32x128xf32>
    %95 = arith.addf %89, %94 : vector<32x128xf32>
    %cst_33 = arith.constant 1.000000e+00 : f32
    %96 = vector.broadcast %cst_33 : f32 to vector<32x128xf32>
    %97 = arith.mulf %96, %95 : vector<32x128xf32>
    %cst_34 = arith.constant 9.99999968E-21 : f32
    %98 = vector.broadcast %cst_34 : f32 to vector<32x128xf32>
    %99 = arith.addf %97, %98 : vector<32x128xf32>
    %100 = math.log %99 : vector<32x128xf32>
    %101 = arith.mulf %100, %46 : vector<32x128xf32>
    %cst_35 = arith.constant dense<0.000000e+00> : vector<128xf32>
    %102 = vector.multi_reduction <add>, %101, %cst_35 [0] : vector<32x128xf32> to vector<128xf32>
    %103 = vector.shape_cast %102 : vector<128xf32> to vector<1x128xf32>
    %104 = arith.subf %35, %34 : vector<32x128xf32>
    %cst_36 = arith.constant 0.0115443133 : f32
    %105 = vector.broadcast %cst_36 : f32 to vector<32x128xf32>
    %106 = arith.subf %104, %105 : vector<32x128xf32>
    %cst_37 = arith.constant 1.000000e+00 : f32
    %107 = vector.broadcast %cst_37 : f32 to vector<32x128xf32>
    %108 = arith.mulf %106, %107 : vector<32x128xf32>
    %cst_38 = arith.constant 0.000000e+00 : f32
    %109 = vector.broadcast %cst_38 : f32 to vector<32x128xf32>
    %110 = arith.maximumf %108, %109 : vector<32x128xf32>
    %111 = math.absf %108 : vector<32x128xf32>
    %cst_39 = arith.constant 0.000000e+00 : f32
    %112 = vector.broadcast %cst_39 : f32 to vector<32x128xf32>
    %113 = arith.subf %112, %111 : vector<32x128xf32>
    %114 = math.exp %113 : vector<32x128xf32>
    %115 = math.log1p %114 : vector<32x128xf32>
    %116 = arith.addf %110, %115 : vector<32x128xf32>
    %cst_40 = arith.constant 1.000000e+00 : f32
    %117 = vector.broadcast %cst_40 : f32 to vector<32x128xf32>
    %118 = arith.mulf %117, %116 : vector<32x128xf32>
    %cst_41 = arith.constant 9.99999968E-21 : f32
    %119 = vector.broadcast %cst_41 : f32 to vector<32x128xf32>
    %120 = arith.addf %118, %119 : vector<32x128xf32>
    %121 = math.log %120 : vector<32x128xf32>
    %122 = arith.mulf %121, %46 : vector<32x128xf32>
    %cst_42 = arith.constant dense<0.000000e+00> : vector<128xf32>
    %123 = vector.multi_reduction <add>, %122, %cst_42 [0] : vector<32x128xf32> to vector<128xf32>
    %124 = vector.shape_cast %123 : vector<128xf32> to vector<1x128xf32>
    %125 = arith.subf %103, %124 : vector<1x128xf32>
    %c0_43 = arith.constant 0 : index
    %c0_44 = arith.constant 0 : index
    %126 = vector.load %arg2[%c0_43, %c0_44] : memref<1x128xf32, #tpu.memory_space<vmem>>, vector<1x128xf32>
    tpu.vector_store %arg2[%c0_43, %c0_44], %125 {strides = array<i32>} : memref<1x128xf32, #tpu.memory_space<vmem>>, vector<1x128xf32>,
    return
  }
  func.func @transform_0(%arg0: i32) -> (i32, i32, i32) {
    %c0_i32 = arith.constant 0 : i32
    %c0_i32_0 = arith.constant 0 : i32
    %c0_i32_1 = arith.constant 0 : i32
    return %c0_i32, %c0_i32_0, %arg0 : i32, i32, i32
  }
  func.func @transform_1(%arg0: i32) -> (i32, i32) {
    %c0_i32 = arith.constant 0 : i32
    %c0_i32_0 = arith.constant 0 : i32
    return %c0_i32, %arg0 : i32, i32
  }
}

</mosaic_0001>

<bundles_post_ra>
// kernel: tpu_custom_call.1
= control target key start
LH: loop header
LB: loop body
LE: loop exit
PB: predicated region body
PF: predicated region fallthrough
CT: control target
= control target key end

     0   :  { %6 = vsyncpa [#allocation3], 0  ;;  %s1370_s0 = inlined_call_operand.hbm [shape: f32[6,32,128], index: 0, kind: input, shape index: {}]   ;;  %s1371_s1 = inlined_call_operand.hbm [shape: f32[1,128], index: 1, kind: output, shape index: {}]  }
   0x1   :  { %7 = vsyncpa [#allocation4], 0  ;;  %s839_s6 = smov [#allocation2]   ;;  %s791_s10 = scalar_lea.hbm %s1370_s0, 3072 }
   0x2   :  { %s13_s7 = sshll.u32 %s839_s6, 4  ;;  %p792_p0 = scmp.ne.s32.totalorder %s1370_s0, %s791_s10  ;;  %s14_s7 = int_to_ptr.vmem [resolvable:$true] %s13_s7 }
   0x3   :  { %p795_p1 = scmp.lt.u32.totalorder %s791_s10, %s1370_s0 }
   0x5   :  { %p797_p2 = pnand %p795_p1, %p792_p0 }
   0x7   :  { %800 = shalt.err (!%p797_p2)
}
   0x8   :  { %s801_s15 = scalar_lea.vmem %s14_s7, 3072  ;;  %p806_p4 = scmp.lt.s32.totalorder %s14_s7, %s14_s7 }
   0x9   :  { %p802_p3 = scmp.ne.s32.totalorder %s14_s7, %s801_s15  ;;  %p807_p5 = scmp.lt.s32.totalorder %s801_s15, %s801_s15 }
   0xb   :  { %p808_p6 = por %p807_p5, %p806_p4 }
   0xd   :  { %p809_p7 = pnand %p808_p6, %p802_p3 }
   0xf   :  { %812 = shalt.err (!%p809_p7)
}
  0x10   :  { %s840_s16 = smov 128   ;;  %s841_s17 = smov 8  }
  0x11   :  { %19 = dma.hbm_to_vmem [thread:$0]  %s1370_s0, 3072, %s14_s7, [#allocation3], %s840_s16, %s840_s16, %s841_s17  }
  0x12   :  { %835 = dma.done.wait [#allocation3], 3072  }
  0x13   :  { %836 = vsyncadd [#allocation3], 4294964224  ;;  %v865_v0 = vld [vmem:[#allocation2 + $0x20] sm:$0xff]  ;;  %v867_v1 = vld [vmem:[#allocation2 + $0x28] sm:$0xff]  ;;  %s842_s0 = smov [#allocation5]  }
  0x14   :  { %v869_v2 = vld [vmem:[#allocation2 + $0x30] sm:$0xff]  ;;  %v871_v3 = vld [vmem:[#allocation2 + $0x38] sm:$0xff]  ;;  %v56_v4 = vand.u32 2147483647, %v865_v0  ;;  %v57_v5 = vand.u32 2147483647, %v867_v1 }
  0x15   :  { %v58_v6 = vand.u32 2147483647, %v869_v2  ;;  %v876_v8 = vld [vmem:[#allocation2 + $0x80] sm:$0xff]  ;;  %v878_v9 = vld [vmem:[#allocation2 + $0x88] sm:$0xff]  ;;  %v59_v10 = vand.u32 2147483647, %v871_v3 }
  0x16   :  { %v60_v7 = vsub.f32 0.0, %v56_v4  ;;  %v61_v11 = vsub.f32 0.0, %v57_v5  ;;  %v881_v12 = vld [vmem:[#allocation2 + $0x90] sm:$0xff]  ;;  %v883_v13 = vld [vmem:[#allocation2 + $0x98] sm:$0xff]  ;;  %v128_v19 = vand.u32 2147483647, %v876_v8 }
  0x17   :  { %v62_v14 = vsub.f32 0.0, %v58_v6  ;;  %v63_v16 = vsub.f32 0.0, %v59_v10  ;;  %v129_v20 = vand.u32 2147483647, %v878_v9  ;;  %v130_v22 = vand.u32 2147483647, %v881_v12 }
  0x18   :  { %v64_v15 = vmul.f32 1.442695, %v60_v7  ;;  %v66_v17 = vmul.f32 1.442695, %v61_v11  ;;  %v131_v23 = vand.u32 2147483647, %v883_v13 }
  0x19   :  { %v68_v18 = vmul.f32 1.442695, %v62_v14  ;;  %v70_v21 = vmul.f32 1.442695, %v63_v16  ;;  %v132_v24 = vsub.f32 0.0, %v128_v19  ;;  %v133_v25 = vsub.f32 0.0, %v129_v20 }
  0x1a   :  { %647 = vpow2.f32 %v64_v15  ;;  %v134_v26 = vsub.f32 0.0, %v130_v22  ;;  %v135_v27 = vsub.f32 0.0, %v131_v23  ;;  %v33_v34 = vld [vmem:[#allocation2 + $0x40] sm:$0xff]  ;;  %v52_v37 = vmax.f32 %v865_v0, 0.0  ;;  %v34_v46 = vld [vmem:[#allocation2 + $0x48] sm:$0xff]  ;;  %v35_v47 = vld [vmem:[#allocation2 + $0x50] sm:$0xff] }
  0x1b   :  { %649 = vpow2.f32 %v66_v17  ;;  %v136_v28 = vmul.f32 1.442695, %v132_v24  ;;  %v138_v29 = vmul.f32 1.442695, %v133_v25  ;;  %v53_v40 = vmax.f32 %v867_v1, 0.0  ;;  %s618_s20 = sshll.u32 %s842_s0, 4  ;;  %s619_s20 = int_to_ptr.vmem [resolvable:$true] %s618_s20 }
  0x1c   :  { %651 = vpow2.f32 %v68_v18  ;;  %v140_v30 = vmul.f32 1.442695, %v134_v26  ;;  %v142_v31 = vmul.f32 1.442695, %v135_v27  ;;  %v54_v43 = vmax.f32 %v869_v2, 0.0  ;;  %s813_s21 = scalar_lea.vmem %s619_s20, 16  ;;  %p818_p9 = scmp.lt.s32.totalorder %s619_s20, %s619_s20 }
  0x1d   :  { %653 = vpow2.f32 %v70_v21  ;;  %v55_v44 = vmax.f32 %v871_v3, 0.0  ;;  %v627_v45 = vmul.f32 -1.442695, %v33_v34  ;;  %v124_v50 = vmax.f32 %v876_v8, 0.0  ;;  %p814_p8 = scmp.ne.s32.totalorder %s619_s20, %s813_s21  ;;  %s817_s22 = scalar_lea.vmem %s619_s20, 32 }
  0x1e   :  { %655 = vpow2.f32 %v136_v28  ;;  %v125_v54 = vmax.f32 %v878_v9, 0.0  ;;  %v126_v55 = vmax.f32 %v881_v12, 0.0  ;;  %v127_v58 = vmax.f32 %v883_v13, 0.0  ;;  %v39_v12 = vld [vmem:[#allocation2 + $0x68] sm:$0xff]  ;;  %p819_p10 = scmp.lt.s32.totalorder %s817_s22, %s813_s21 }
  0x1f   :  { %657 = vpow2.f32 %v138_v29  ;;  %v628_v62 = vmul.f32 -1.442695, %v34_v46  ;;  %v905_v63 = vmul.f32 -1.442695, %v35_v47 }
  0x20   :  { %659 = vpow2.f32 %v140_v30  ;;  %p820_p11 = por %p819_p10, %p818_p9 }
  0x21   :  { %661 = vpow2.f32 %v142_v31 }
  0x22   :  { %p821_p12 = pnand %p820_p11, %p814_p8 }
  0x24   :  { %v648_v32 = vpop.eup %647 }
  0x25   :  { %v650_v33 = vpop.eup %649  ;;  %v72_v35 = vadd.f32 1.0, %v648_v32  ;;  %v75_v41 = vmul.f32 -0.5, %v648_v32  ;;  %v78_v52 = vand.u32 2147483647, %v648_v32 }
  0x26   :  { %v652_v36 = vpop.eup %651  ;;  %v81_v38 = vadd.f32 1.0, %v650_v33  ;;  %v84_v48 = vmul.f32 -0.5, %v650_v33  ;;  %v87_v6 = vand.u32 2147483647, %v650_v33 }
  0x27   :  { %v890_v39 = vpop.eup %653  ;;  %663 = vlog2.f32 %v72_v35  ;;  %v90_v42 = vadd.f32 1.0, %v652_v36  ;;  %v93_v53 = vmul.f32 -0.5, %v652_v36  ;;  %v76_v57 = vadd.f32 1.0, %v75_v41 }
  0x28   :  { %665 = vlog2.f32 %v81_v38  ;;  %v99_v49 = vadd.f32 1.0, %v890_v39  ;;  %v656_v51 = vpop.eup %655  ;;  %v102_v61 = vmul.f32 -0.5, %v890_v39  ;;  %v85_v5 = vadd.f32 1.0, %v84_v48 }
  0x29   :  { %667 = vlog2.f32 %v90_v42  ;;  %v899_v56 = vpop.eup %657  ;;  %v144_v59 = vadd.f32 1.0, %v656_v51  ;;  %vm910_vm0 = vcmp.lt.f32.partialorder %v78_v52, 0.0004427343  ;;  %v94_v11 = vadd.f32 1.0, %v93_v53 }
  0x2a   :  { %669 = vlog2.f32 %v99_v49  ;;  %v902_v60 = vpop.eup %659  ;;  %v153_v7 = vadd.f32 1.0, %v899_v56  ;;  %v147_v14 = vmul.f32 -0.5, %v656_v51  ;;  %v77_v16 = vmul.f32 %v648_v32, %v76_v57 }
  0x2b   :  { %671 = vpow2.f32 %v627_v45  ;;  %v907_v4 = vpop.eup %661  ;;  %v162_v15 = vadd.f32 1.0, %v902_v60  ;;  %v96_v17 = vand.u32 2147483647, %v652_v36  ;;  %v156_v18 = vmul.f32 -0.5, %v899_v56 }
  0x2c   :  { %673 = vlog2.f32 %v144_v59  ;;  %v103_v19 = vadd.f32 1.0, %v102_v61  ;;  %v105_v20 = vand.u32 2147483647, %v890_v39  ;;  %v171_v21 = vadd.f32 1.0, %v907_v4 }
  0x2d   :  { %675 = vlog2.f32 %v153_v7  ;;  %v86_v23 = vmul.f32 %v650_v33, %v85_v5  ;;  %vm918_vm1 = vcmp.lt.f32.partialorder %v87_v6, 0.0004427343  ;;  %v150_v25 = vand.u32 2147483647, %v656_v51  ;;  %v36_v5 = vld [vmem:[#allocation2 + $0x58] sm:$0xff] }
  0x2e   :  { %677 = vlog2.f32 %v162_v15  ;;  %v165_v26 = vmul.f32 -0.5, %v902_v60  ;;  %v95_v29 = vmul.f32 %v652_v36, %v94_v11  ;;  %v148_v30 = vadd.f32 1.0, %v147_v14 }
  0x2f   :  { %679 = vlog2.f32 %v171_v21  ;;  %vm923_vm2 = vcmp.lt.f32.partialorder %v96_v17, 0.0004427343  ;;  %v157_v35 = vadd.f32 1.0, %v156_v18  ;;  %v174_v33 = vmul.f32 -0.5, %v907_v4 }
  0x30   :  { %v104_v42 = vmul.f32 %v890_v39, %v103_v19  ;;  %vm931_vm3 = vcmp.lt.f32.partialorder %v105_v20, 0.0004427343  ;;  %vm937_vm4 = vcmp.lt.f32.partialorder %v150_v25, 0.0004427343  ;;  %v159_v48 = vand.u32 2147483647, %v899_v56 }
  0x31   :  { %v664_v22 = vpop.eup %663  ;;  %v166_v49 = vadd.f32 1.0, %v165_v26  ;;  %v149_v57 = vmul.f32 %v656_v51, %v148_v30  ;;  %v168_v59 = vand.u32 2147483647, %v902_v60  ;;  %v158_v7 = vmul.f32 %v899_v56, %v157_v35  ;;  %v24_v25 = vld [vmem:[#allocation2 + $0x8] sm:$0xff]  ;;  %v26_v30 = vld [vmem:[#allocation2 + $0x18] sm:$0xff]  ;;  %v38_v35 = vld [vmem:[#allocation2 + $0x60] sm:$0xff] }
  0x32   :  { %v666_v27 = vpop.eup %665  ;;  %v74_v28 = vmul.f32 0.6931472, %v664_v22  ;;  %v175_v10 = vadd.f32 1.0, %v174_v33  ;;  %v177_v11 = vand.u32 2147483647, %v907_v4  ;;  %681 = vpow2.f32 %v628_v62  ;;  %v23_v62 = vld [vmem:[#allocation2] sm:$0xff] }
  0x33   :  { %v668_v31 = vpop.eup %667  ;;  %v83_v32 = vmul.f32 0.6931472, %v666_v27  ;;  %vm959_vm5 = vcmp.lt.f32.partialorder %v159_v48, 0.0004427343  ;;  %v167_v56 = vmul.f32 %v902_v60, %v166_v49  ;;  %vm966_vm6 = vcmp.lt.f32.partialorder %v168_v59, 0.0004427343 }
  0x34   :  { %v80_v38 = vsel %vm910_vm0, %v77_v16, %v74_v28  ;;  %v92_v41 = vmul.f32 0.6931472, %v668_v31  ;;  %v670_v36 = vpop.eup %669  ;;  %vm971_vm7 = vcmp.lt.f32.partialorder %v177_v11, 0.0004427343  ;;  %v48_v31 = vld [vmem:[#allocation2 + $0xa0] sm:$0xff]  ;;  %683 = vpow2.f32 %v905_v63 }
  0x35   :  { %v89_v46 = vsel %vm918_vm1, %v86_v23, %v83_v32  ;;  %v942_v52 = vpop.eup %671  ;;  %v101_v53 = vmul.f32 0.6931472, %v670_v36  ;;  %v108_v6 = vadd.f32 %v80_v38, %v52_v37  ;;  %v631_v36 = vmul.f32 -1.442695, %v48_v31 }
  0x36   :  { %v98_v39 = vsel %vm923_vm2, %v95_v29, %v92_v41  ;;  %v674_v61 = vpop.eup %673  ;;  %v109_v15 = vadd.f32 %v89_v46, %v53_v40  ;;  %v25_v29 = vld [vmem:[#allocation2 + $0x10] sm:$0xff] }
  0x37   :  { %v107_v14 = vsel %vm931_vm3, %v104_v42, %v101_v53  ;;  %v110_v51 = vadd.f32 %v98_v39, %v54_v43  ;;  %v146_v16 = vmul.f32 0.6931472, %v674_v61  ;;  %v676_v17 = vpop.eup %675  ;;  %v630_v43 = vmul.f32 -1.442695, %v36_v5 }
  0x38   :  { %v111_v0 = vadd.f32 %v107_v14, %v55_v44  ;;  %v678_v18 = vpop.eup %677  ;;  %v155_v40 = vmul.f32 0.6931472, %v676_v17  ;;  %v112_v19 = vmul.f32 0.5, %v108_v6  ;;  %v176_v44 = vmul.f32 %v907_v4, %v175_v10 }
  0x39   :  { %v152_v1 = vsel %vm937_vm4, %v149_v57, %v146_v16  ;;  %v164_v3 = vmul.f32 0.6931472, %v678_v18  ;;  %v680_v60 = vpop.eup %679  ;;  %v113_v21 = vmul.f32 0.5, %v109_v15  ;;  %v114_v22 = vmul.f32 0.5, %v110_v51 }
  0x3a   :  { %v161_v23 = vsel %vm959_vm5, %v158_v7, %v155_v40  ;;  %v180_v24 = vadd.f32 %v152_v1, %v124_v50  ;;  %v115_v26 = vmul.f32 0.5, %v111_v0  ;;  %v979_v27 = vsub.f32 %v23_v62, %v112_v19 }
  0x3b   :  { %v170_v4 = vsel %vm966_vm6, %v167_v56, %v164_v3  ;;  %v173_v28 = vmul.f32 0.6931472, %v680_v60  ;;  %v983_v32 = vsub.f32 %v24_v25, %v113_v21  ;;  %v181_v34 = vadd.f32 %v161_v23, %v125_v54 }
  0x3c   :  { %v182_v8 = vadd.f32 %v170_v4, %v126_v55  ;;  %v184_v50 = vmul.f32 0.5, %v180_v24  ;;  %v989_v33 = vsub.f32 %v25_v29, %v114_v22  ;;  %v991_v38 = vsub.f32 %v26_v30, %v115_v26  ;;  %v40_v55 = vld [vmem:[#allocation2 + $0x70] sm:$0xff]  ;;  %v682_v13 = vpop.eup %681 }
  0x3d   :  { %v179_v41 = vsel %vm971_vm7, %v176_v44, %v173_v28  ;;  %v185_v45 = vmul.f32 0.5, %v181_v34  ;;  %685 = vpow2.f32 %v630_v43  ;;  %v1001_v46 = vmul.f32 100.0, %v979_v27 }
  0x3e   :  { %v183_v42 = vadd.f32 %v179_v41, %v127_v58  ;;  %v186_v9 = vmul.f32 0.5, %v182_v8  ;;  %v998_v54 = vsub.f32 %v38_v35, %v184_v50  ;;  %v1008_v63 = vmul.f32 100.0, %v983_v32  ;;  %v41_v58 = vld [vmem:[#allocation2 + $0x78] sm:$0xff]  ;;  %v684_v43 = vpop.eup %683 }
  0x3f   :  { %v1003_v48 = vsub.f32 %v39_v12, %v185_v45  ;;  %v1010_v39 = vadd.f32 %v112_v19, %v23_v62  ;;  %v1012_v53 = vadd.f32 %v113_v21, %v24_v25  ;;  %v1015_v57 = vmul.f32 100.0, %v989_v33 }
  0x40   :  { %v187_v47 = vmul.f32 0.5, %v183_v42  ;;  %v1005_v49 = vsub.f32 %v40_v55, %v186_v9  ;;  %v1018_v59 = vmul.f32 100.0, %v998_v54  ;;  %v1023_v5 = vmul.f32 100.0, %v991_v38 }
  0x41   :  { %v1026_v6 = vmul.f32 100.0, %v1003_v48  ;;  %v1031_v10 = vadd.f32 %v114_v22, %v25_v29  ;;  %687 = vpow2.f32 %v631_v36  ;;  %v1035_v14 = vadd.f32 %v115_v26, %v26_v30 }
  0x42   :  { %v1020_v61 = vsub.f32 %v41_v58, %v187_v47  ;;  %v1029_v7 = vmul.f32 100.0, %v1005_v49  ;;  %v260_v11 = vsub.f32 %v1001_v46, %v1018_v59  ;;  %v1037_v15 = vadd.f32 %v184_v50, %v38_v35  ;;  %v49_v35 = vld [vmem:[#allocation2 + $0xa8] sm:$0xff] }
  0x43   :  { %1393 = vst [vmem:[#allocation8_spill] sm:$0xff] %v1031_v10  ;;  %v261_v16 = vsub.f32 %v1008_v63, %v1026_v6  ;;  %v1044_v17 = vadd.f32 %v185_v45, %v39_v12  ;;  %v324_v56 = vsub.f32 0.0, %v1010_v39  ;;  %v1049_v18 = vadd.f32 %v186_v9, %v40_v55 }
  0x44   :  { %v1040_v51 = vmul.f32 100.0, %v1020_v61  ;;  %v262_v0 = vsub.f32 %v1015_v57, %v1029_v7  ;;  %v264_v37 = vand.u32 2147483647, %v260_v11  ;;  %v325_v2 = vsub.f32 0.0, %v1012_v53 }
  0x45   :  { %1394 = vst [vmem:[#allocation9_spill] sm:$0xff] %v1049_v18  ;;  %v265_v40 = vand.u32 2147483647, %v261_v16  ;;  %v1054_v19 = vadd.f32 %v187_v47, %v41_v58  ;;  %v326_v20 = vsub.f32 0.0, %v1031_v10  ;;  %v327_v21 = vsub.f32 0.0, %v1035_v14  ;;  %v50_v47 = vld [vmem:[#allocation2 + $0xb0] sm:$0xff] }
  0x46   :  { %v263_v1 = vsub.f32 %v1023_v5, %v1040_v51  ;;  %v266_v3 = vand.u32 2147483647, %v262_v0  ;;  %v268_v44 = vsub.f32 0.0, %v264_v37  ;;  %v332_v22 = vsub.f32 0.0, %v1037_v15  ;;  %v51_v16 = vld [vmem:[#allocation2 + $0xb8] sm:$0xff] }
  0x47   :  { %v269_v62 = vsub.f32 0.0, %v265_v40  ;;  %v1059_v23 = vpop.eup %685  ;;  %v208_v24 = vadd.f32 1.0, %v942_v52  ;;  %v333_v4 = vsub.f32 0.0, %v1044_v17  ;;  %v1063_v30 = vmul.f32 100.0, %v324_v56 }
  0x48   :  { %v267_v60 = vand.u32 2147483647, %v263_v1  ;;  %1395 = vst [vmem:[#allocation10_spill] sm:$0xff] %v1059_v23  ;;  %v270_v25 = vsub.f32 0.0, %v266_v3  ;;  %v272_v26 = vmul.f32 1.442695, %v268_v44 }
  0x49   :  { %v274_v29 = vmul.f32 1.442695, %v269_v62  ;;  %v1065_v31 = vmul.f32 100.0, %v325_v2  ;;  %v334_v8 = vsub.f32 0.0, %v1049_v18  ;;  %v335_v50 = vsub.f32 0.0, %v1054_v19 }
  0x4a   :  { %v271_v28 = vsub.f32 0.0, %v267_v60  ;;  %689 = vpow2.f32 %v272_v26  ;;  %v276_v34 = vmul.f32 1.442695, %v270_v25  ;;  %v1069_v42 = vmul.f32 100.0, %v326_v20 }
  0x4b   :  { %v1071_v52 = vmul.f32 100.0, %v327_v21  ;;  %v1073_v45 = vmul.f32 100.0, %v332_v22  ;;  %v688_v9 = vpop.eup %687  ;;  %691 = vpow2.f32 %v274_v29  ;;  %v1075_v12 = vmul.f32 100.0, %v333_v4 }
  0x4c   :  { %v278_v41 = vmul.f32 1.442695, %v271_v28  ;;  %v1077_v55 = vmul.f32 100.0, %v334_v8  ;;  %v1079_v36 = vmul.f32 100.0, %v335_v50  ;;  %v209_v58 = vadd.f32 1.0, %v682_v13 }
  0x4d   :  { %693 = vpow2.f32 %v276_v34  ;;  %v344_v11 = vsub.f32 %v1063_v30, %v1073_v45  ;;  %v210_v0 = vadd.f32 1.0, %v684_v43  ;;  %v632_v37 = vmul.f32 -1.442695, %v49_v35 }
  0x4e   :  { %695 = vpow2.f32 %v278_v41  ;;  %v345_v56 = vsub.f32 %v1065_v31, %v1075_v12  ;;  %v346_v1 = vsub.f32 %v1069_v42, %v1077_v55  ;;  %v347_v40 = vsub.f32 %v1071_v52, %v1079_v36 }
  0x4f   :  { %v348_v2 = vand.u32 2147483647, %v344_v11  ;;  %697 = vrcp.f32 %v208_v24  ;;  %v633_v13 = vmul.f32 -1.442695, %v50_v47  ;;  %v634_v3 = vmul.f32 -1.442695, %v51_v16 }
  0x50   :  { %699 = vrcp.f32 %v209_v58  ;;  %v349_v44 = vand.u32 2147483647, %v345_v56  ;;  %v350_v20 = vand.u32 2147483647, %v346_v1  ;;  %v351_v43 = vand.u32 2147483647, %v347_v40 }
  0x51   :  { %701 = vrcp.f32 %v210_v0  ;;  %v352_v60 = vsub.f32 0.0, %v348_v2  ;;  %v1096_v29 = vadd.f32 1.0, %v688_v9  ;;  %v517_v16 = vsub.f32 %v1037_v15, %v998_v54 }
  0x52   :  { %703 = vpow2.f32 %v632_v37  ;;  %v353_v21 = vsub.f32 0.0, %v349_v44  ;;  %v354_v26 = vsub.f32 0.0, %v350_v20  ;;  %v355_v24 = vsub.f32 0.0, %v351_v43 }
  0x53   :  { %705 = vpow2.f32 %v633_v13  ;;  %v356_v22 = vmul.f32 1.442695, %v352_v60  ;;  %1396 = vst [vmem:[#allocation11_spill] sm:$0xff] %v1096_v29  ;;  %v519_v60 = vsub.f32 %v1049_v18, %v1005_v49  ;;  %v520_v13 = vsub.f32 %v1054_v19, %v1020_v61 }
  0x54   :  { %v1089_v62 = vpop.eup %689  ;;  %707 = vpow2.f32 %v634_v3  ;;  %v358_v47 = vmul.f32 1.442695, %v353_v21  ;;  %v360_v11 = vmul.f32 1.442695, %v354_v26  ;;  %v362_v1 = vmul.f32 1.442695, %v355_v24 }
  0x55   :  { %v280_v25 = vadd.f32 1.0, %v1089_v62  ;;  %v1092_v4 = vpop.eup %691  ;;  %709 = vpow2.f32 %v356_v22  ;;  %v283_v37 = vmul.f32 -0.5, %v1089_v62  ;;  %v518_v3 = vsub.f32 %v1044_v17, %v1003_v48 }
  0x56   :  { %v289_v34 = vadd.f32 1.0, %v1092_v4  ;;  %v286_v22 = vand.u32 2147483647, %v1089_v62  ;;  %v1137_v26 = vadd.f32 -0.011544313, %v517_v16 }
  0x57   :  { %v1094_v28 = vpop.eup %693  ;;  %711 = vlog2.f32 %v280_v25  ;;  %v1149_v25 = vadd.f32 -0.011544313, %v518_v3  ;;  %v1156_v9 = vadd.f32 -0.011544313, %v519_v60  ;;  %v295_v3 = vand.u32 2147483647, %v1092_v4 }
  0x58   :  { %v1099_v8 = vpop.eup %695  ;;  %v298_v41 = vadd.f32 1.0, %v1094_v28  ;;  %713 = vlog2.f32 %v289_v34  ;;  %1401 = vst [vmem:[#allocation16_spill] sm:$0xff] %v1137_v26  ;;  %v284_v34 = vadd.f32 1.0, %v283_v37  ;;  %v292_v37 = vmul.f32 -0.5, %v1092_v4 }
  0x59   :  { %v1112_v0 = vpop.eup %697  ;;  %v307_v2 = vadd.f32 1.0, %v1099_v8  ;;  %1404 = vst [vmem:[#allocation19_spill] sm:$0xff] %v1149_v25  ;;  %1405 = vst [vmem:[#allocation20_spill] sm:$0xff] %v1156_v9  ;;  %vm1158_vm8 = vcmp.lt.f32.partialorder %v286_v22, 0.0004427343  ;;  %v310_v35 = vmul.f32 -0.5, %v1099_v8 }
  0x5a   :  { %1397 = vst [vmem:[#allocation12_spill] sm:$0xff] %v1112_v0  ;;  %v1117_v40 = vpop.eup %699  ;;  %715 = vlog2.f32 %v298_v41  ;;  %v285_v58 = vmul.f32 %v1089_v62, %v284_v34  ;;  %v304_v56 = vand.u32 2147483647, %v1094_v28  ;;  %v530_v22 = vand.u32 2147483647, %v1149_v25 }
  0x5b   :  { %1398 = vst [vmem:[#allocation13_spill] sm:$0xff] %v1117_v40  ;;  %v1124_v44 = vpop.eup %701  ;;  %717 = vpow2.f32 %v358_v47  ;;  %v293_v40 = vadd.f32 1.0, %v292_v37  ;;  %vm1170_vm9 = vcmp.lt.f32.partialorder %v295_v3, 0.0004427343  ;;  %v1178_v34 = vadd.f32 -0.011544313, %v520_v13 }
  0x5c   :  { %1399 = vst [vmem:[#allocation14_spill] sm:$0xff] %v1124_v44  ;;  %v1132_v21 = vpop.eup %703  ;;  %719 = vpow2.f32 %v360_v11  ;;  %v529_v11 = vand.u32 2147483647, %v1137_v26  ;;  %vm1180_vm10 = vcmp.lt.f32.partialorder %v304_v56, 0.0004427343  ;;  %v311_v37 = vadd.f32 1.0, %v310_v35 }
  0x5d   :  { %1400 = vst [vmem:[#allocation15_spill] sm:$0xff] %v1132_v21  ;;  %v1139_v24 = vpop.eup %705  ;;  %721 = vpow2.f32 %v362_v1  ;;  %v301_v1 = vmul.f32 -0.5, %v1094_v28  ;;  %v534_v25 = vsub.f32 0.0, %v530_v22  ;;  %v294_v56 = vmul.f32 %v1092_v4, %v293_v40 }
  0x5e   :  { %1402 = vst [vmem:[#allocation17_spill] sm:$0xff] %v1139_v24  ;;  %v1145_v43 = vpop.eup %707  ;;  %723 = vlog2.f32 %v307_v2  ;;  %v533_v41 = vsub.f32 0.0, %v529_v11  ;;  %v532_v10 = vand.u32 2147483647, %v1178_v34 }
  0x5f   :  { %1403 = vst [vmem:[#allocation18_spill] sm:$0xff] %v1145_v43  ;;  %v710_v16 = vpop.eup %709  ;;  %v302_v0 = vadd.f32 1.0, %v301_v1  ;;  %v531_v43 = vand.u32 2147483647, %v1156_v9 }
  0x60   :  { %v364_v20 = vadd.f32 1.0, %v710_v16  ;;  %v367_v50 = vmul.f32 -0.5, %v710_v16  ;;  %v537_v23 = vmul.f32 1.442695, %v533_v41  ;;  %v313_v41 = vand.u32 2147483647, %v1099_v8 }
  0x61   :  { %v712_v47 = vpop.eup %711  ;;  %v303_v26 = vmul.f32 %v1094_v28, %v302_v0  ;;  %v535_v29 = vsub.f32 0.0, %v531_v43  ;;  %v370_v18 = vand.u32 2147483647, %v710_v16  ;;  %v539_v28 = vmul.f32 1.442695, %v534_v25 }
  0x62   :  { %v282_v60 = vmul.f32 0.6931472, %v712_v47  ;;  %725 = vlog2.f32 %v364_v20  ;;  %v714_v44 = vpop.eup %713  ;;  %v368_v62 = vadd.f32 1.0, %v367_v50  ;;  %v312_v50 = vmul.f32 %v1099_v8, %v311_v37 }
  0x63   :  { %727 = vpow2.f32 %v537_v23  ;;  %v291_v13 = vmul.f32 0.6931472, %v714_v44  ;;  %v541_v43 = vmul.f32 1.442695, %v535_v29  ;;  %vm1203_vm11 = vcmp.lt.f32.partialorder %v313_v41, 0.0004427343 }
  0x64   :  { %v716_v24 = vpop.eup %715  ;;  %v288_v3 = vsel %vm1158_vm8, %v285_v58, %v282_v60  ;;  %v1412_v58 = vmax.f32 %v1001_v46, %v1018_v59  ;;  %v369_v22 = vmul.f32 %v710_v16, %v368_v62  ;;  %vm1207_vm12 = vcmp.lt.f32.partialorder %v370_v18, 0.0004427343 }
  0x65   :  { %v718_v47 = vpop.eup %717  ;;  %v300_v2 = vmul.f32 0.6931472, %v716_v24  ;;  %v536_v59 = vsub.f32 0.0, %v532_v10  ;;  %v1417_v29 = vmax.f32 %v1008_v63, %v1026_v6  ;;  %v1429_v46 = vmax.f32 %v1065_v31, %v1075_v12 }
  0x66   :  { %v1185_v1 = vpop.eup %719  ;;  %v373_v9 = vadd.f32 1.0, %v718_v47  ;;  %v316_v60 = vadd.f32 %v288_v3, %v1412_v58  ;;  %v376_v44 = vmul.f32 -0.5, %v718_v47  ;;  %v379_v62 = vand.u32 2147483647, %v718_v47 }
  0x67   :  { %v1189_v20 = vpop.eup %721  ;;  %v382_v23 = vadd.f32 1.0, %v1185_v1  ;;  %v385_v40 = vmul.f32 -0.5, %v1185_v1  ;;  %v306_v37 = vsel %vm1180_vm10, %v303_v26, %v300_v2  ;;  %v1418_v26 = vmax.f32 %v1063_v30, %v1073_v45 }
  0x68   :  { %v724_v35 = vpop.eup %723  ;;  %729 = vlog2.f32 %v373_v9  ;;  %v391_v4 = vadd.f32 1.0, %v1189_v20  ;;  %v297_v9 = vsel %vm1170_vm9, %v294_v56, %v291_v13  ;;  %v377_v25 = vadd.f32 1.0, %v376_v44 }
  0x69   :  { %731 = vlog2.f32 %v382_v23  ;;  %v309_v0 = vmul.f32 0.6931472, %v724_v35  ;;  %v394_v21 = vmul.f32 -0.5, %v1189_v20  ;;  %v317_v41 = vadd.f32 %v297_v9, %v1417_v29 }
  0x6a   :  { %733 = vlog2.f32 %v391_v4  ;;  %v320_v3 = vmul.f32 0.01, %v316_v60  ;;  %v386_v56 = vadd.f32 1.0, %v385_v40  ;;  %v388_v35 = vand.u32 2147483647, %v1185_v1 }
  0x6b   :  { %735 = vpow2.f32 %v539_v28  ;;  %v315_v13 = vsel %vm1203_vm11, %v312_v50, %v309_v0  ;;  %v543_v63 = vmul.f32 1.442695, %v536_v59  ;;  %v1419_v23 = vmax.f32 %v1015_v57, %v1029_v7  ;;  %v1438_v50 = vld [vmem:[#allocation8_spill] sm:$0xff] }
  0x6c   :  { %v726_v24 = vpop.eup %725  ;;  %737 = vpow2.f32 %v541_v43  ;;  %v378_v58 = vmul.f32 %v718_v47, %v377_v25  ;;  %vm1231_vm13 = vcmp.lt.f32.partialorder %v379_v62, 0.0004427343  ;;  %v395_v60 = vadd.f32 1.0, %v394_v21 }
  0x6d   :  { %v366_v16 = vmul.f32 0.6931472, %v726_v24  ;;  %v1217_v18 = vpop.eup %727  ;;  %v318_v2 = vadd.f32 %v306_v37, %v1419_v23  ;;  %v1422_v30 = vmax.f32 %v979_v27, %v998_v54  ;;  %v1423_v28 = vmax.f32 %v1023_v5, %v1040_v51 }
  0x6e   :  { %v545_v6 = vadd.f32 1.0, %v1217_v18  ;;  %v387_v47 = vmul.f32 %v1185_v1, %v386_v56  ;;  %v419_v9 = vmin.f32 %v1035_v14, %v1054_v19  ;;  %v321_v40 = vmul.f32 0.01, %v317_v41 }
  0x6f   :  { %v372_v10 = vsel %vm1207_vm12, %v369_v22, %v366_v16  ;;  %v397_v22 = vand.u32 2147483647, %v1189_v20  ;;  %v412_v45 = vmax.f32 %v320_v3, %v1422_v30  ;;  %v319_v57 = vadd.f32 %v315_v13, %v1423_v28 }
  0x70   :  { %v400_v11 = vadd.f32 %v372_v10, %v1418_v26  ;;  %739 = vlog2.f32 %v545_v6  ;;  %vm1245_vm14 = vcmp.lt.f32.partialorder %v388_v35, 0.0004427343  ;;  %v1426_v27 = vmin.f32 %v1010_v39, %v1037_v15 }
  0x71   :  { %741 = vpow2.f32 %v543_v63  ;;  %v396_v1 = vmul.f32 %v1189_v20, %v395_v60  ;;  %v548_v24 = vmul.f32 -0.5, %v1217_v18  ;;  %v322_v19 = vmul.f32 0.01, %v318_v2 }
  0x72   :  { %v730_v44 = vpop.eup %729  ;;  %v404_v4 = vmul.f32 -0.01, %v400_v11  ;;  %vm1256_vm15 = vcmp.lt.f32.partialorder %v397_v22, 0.0004427343  ;;  %v323_v59 = vmul.f32 0.01, %v319_v57  ;;  %v1430_v21 = vmax.f32 %v1069_v42, %v1077_v55 }
  0x73   :  { %v375_v7 = vmul.f32 0.6931472, %v730_v44  ;;  %v732_v0 = vpop.eup %731  ;;  %v551_v20 = vand.u32 2147483647, %v1217_v18  ;;  %v1431_v41 = vmax.f32 %v983_v32, %v1003_v48  ;;  %v549_v10 = vadd.f32 1.0, %v548_v24  ;;  %v1441_v57 = vld [vmem:[#allocation11_spill] sm:$0xff] }
  0x74   :  { %v420_v54 = vmin.f32 %v404_v4, %v1426_v27  ;;  %v384_v51 = vmul.f32 0.6931472, %v732_v0  ;;  %v734_v14 = vpop.eup %733  ;;  %v1432_v26 = vmax.f32 %v1071_v52, %v1079_v36  ;;  %v1433_v55 = vmax.f32 %v989_v33, %v1005_v49  ;;  %v1439_v33 = vld [vmem:[#allocation9_spill] sm:$0xff]  ;;  %v1442_v27 = vld [vmem:[#allocation16_spill] sm:$0xff] }
  0x75   :  { %v381_v5 = vsel %vm1231_vm13, %v378_v58, %v375_v7  ;;  %v393_v25 = vmul.f32 0.6931472, %v734_v14  ;;  %v736_v62 = vpop.eup %735  ;;  %v413_v3 = vmax.f32 %v321_v40, %v1431_v41  ;;  %v1434_v32 = vmin.f32 %v1012_v53, %v1044_v17  ;;  %v1445_v41 = vld [vmem:[#allocation19_spill] sm:$0xff] }
  0x76   :  { %v401_v39 = vadd.f32 %v381_v5, %v1429_v46  ;;  %v424_v15 = vsub.f32 %v420_v54, %v412_v45  ;;  %v390_v16 = vsel %vm1245_vm14, %v387_v47, %v384_v51  ;;  %v738_v12 = vpop.eup %737  ;;  %v554_v56 = vadd.f32 1.0, %v736_v62 }
  0x77   :  { %v402_v37 = vadd.f32 %v390_v16, %v1430_v21  ;;  %v399_v13 = vsel %vm1256_vm15, %v396_v1, %v393_v25  ;;  %v557_v35 = vmul.f32 -0.5, %v736_v62  ;;  %v414_v63 = vmax.f32 %v322_v19, %v1433_v55 }
  0x78   :  { %v405_v29 = vmul.f32 -0.01, %v401_v39  ;;  %v1272_v31 = vadd.f32 -0.011544313, %v424_v15  ;;  %v403_v11 = vadd.f32 %v399_v13, %v1432_v26  ;;  %v1435_v6 = vmax.f32 %v991_v38, %v1020_v61 }
  0x79   :  { %v406_v42 = vmul.f32 -0.01, %v402_v37  ;;  %vm1289_vm0 = vcmp.lt.f32.partialorder %v551_v20, 0.0004427343  ;;  %743 = vlog2.f32 %v554_v56  ;;  %v1440_v49 = vmin.f32 %v1438_v50, %v1439_v33  ;;  %v1443_v20 = vld [vmem:[#allocation15_spill] sm:$0xff]  ;;  %v1444_v37 = vld [vmem:[#allocation17_spill] sm:$0xff] }
  0x7a   :  { %v421_v48 = vmin.f32 %v405_v29, %v1434_v32  ;;  %v415_v23 = vmax.f32 %v323_v59, %v1435_v6  ;;  %v436_v2 = vand.u32 2147483647, %v1272_v31  ;;  %v740_v52 = vpop.eup %739  ;;  %v407_v36 = vmul.f32 -0.01, %v403_v11 }
  0x7b   :  { %v422_v60 = vmin.f32 %v406_v42, %v1440_v49  ;;  %v563_v53 = vadd.f32 1.0, %v738_v12  ;;  %v547_v22 = vmul.f32 0.6931472, %v740_v52  ;;  %v550_v38 = vmul.f32 %v1217_v18, %v549_v10  ;;  %v1297_v4 = vpop.eup %741 }
  0x7c   :  { %v425_v44 = vsub.f32 %v421_v48, %v413_v3  ;;  %v440_v17 = vsub.f32 0.0, %v436_v2  ;;  %v558_v61 = vadd.f32 1.0, %v557_v35  ;;  %v423_v30 = vmin.f32 %v407_v36, %v419_v9  ;;  %v1448_v35 = vld [vmem:[#allocation20_spill] sm:$0xff]  ;;  %v1451_v36 = vld [vmem:[#allocation10_spill] sm:$0xff] }
  0x7d   :  { %v426_v45 = vsub.f32 %v422_v60, %v414_v63  ;;  %745 = vlog2.f32 %v563_v53  ;;  %v566_v47 = vmul.f32 -0.5, %v738_v12  ;;  %v525_v54 = vmax.f32 %v1442_v27, 0.0 }
  0x7e   :  { %v1299_v28 = vadd.f32 -0.011544313, %v425_v44  ;;  %747 = vrcp.f32 %v1441_v57  ;;  %v444_v7 = vmul.f32 1.442695, %v440_v17  ;;  %v427_v0 = vsub.f32 %v423_v30, %v415_v23 }
  0x7f   :  { %v1302_v40 = vadd.f32 -0.011544313, %v426_v45  ;;  %v553_v18 = vsel %vm1289_vm0, %v550_v38, %v547_v22  ;;  %v560_v9 = vand.u32 2147483647, %v736_v62  ;;  %v572_v5 = vadd.f32 1.0, %v1297_v4  ;;  %v1452_v22 = vld [vmem:[#allocation18_spill] sm:$0xff] }
  0x80   :  { %v437_v43 = vand.u32 2147483647, %v1299_v28  ;;  %749 = vpow2.f32 %v444_v7  ;;  %v1309_v51 = vadd.f32 -0.011544313, %v427_v0  ;;  %v559_v14 = vmul.f32 %v736_v62, %v558_v61 }
  0x81   :  { %v438_v1 = vand.u32 2147483647, %v1302_v40  ;;  %v567_v19 = vadd.f32 1.0, %v566_v47  ;;  %v569_v8 = vand.u32 2147483647, %v738_v12  ;;  %751 = vlog2.f32 %v572_v5 }
  0x82   :  { %v441_v24 = vsub.f32 0.0, %v437_v43  ;;  %v575_v46 = vmul.f32 -0.5, %v1297_v4  ;;  %v439_v39 = vand.u32 2147483647, %v1309_v51  ;;  %v581_v16 = vadd.f32 %v553_v18, %v525_v54 }
  0x83   :  { %v442_v15 = vsub.f32 0.0, %v438_v1  ;;  %v744_v25 = vpop.eup %743  ;;  %v233_v21 = vadd.f32 1.0, %v1443_v20  ;;  %v234_v29 = vadd.f32 1.0, %v1444_v37  ;;  %v526_v3 = vmax.f32 %v1445_v41, 0.0  ;;  %v1456_v41 = vld [vmem:[#allocation13_spill] sm:$0xff] }
  0x84   :  { %v446_v59 = vmul.f32 1.442695, %v441_v24  ;;  %vm1317_vm1 = vcmp.lt.f32.partialorder %v560_v9, 0.0004427343  ;;  %v443_v62 = vsub.f32 0.0, %v439_v39  ;;  %v527_v26 = vmax.f32 %v1448_v35, 0.0 }
  0x85   :  { %v448_v10 = vmul.f32 1.442695, %v442_v15  ;;  %v556_v56 = vmul.f32 0.6931472, %v744_v25  ;;  %v568_v11 = vmul.f32 %v738_v12, %v567_v19  ;;  %vm1322_vm2 = vcmp.lt.f32.partialorder %v569_v8, 0.0004427343 }
  0x86   :  { %753 = vpow2.f32 %v446_v59  ;;  %v576_v55 = vadd.f32 1.0, %v575_v46  ;;  %v450_v32 = vmul.f32 1.442695, %v443_v62  ;;  %v585_v6 = vadd.f32 1e-20, %v581_v16  ;;  %v1453_v39 = vld [vmem:[#allocation12_spill] sm:$0xff] }
  0x87   :  { %v746_v63 = vpop.eup %745  ;;  %755 = vpow2.f32 %v448_v10  ;;  %v562_v48 = vsel %vm1317_vm1, %v559_v14, %v556_v56  ;;  %v578_v58 = vand.u32 2147483647, %v1297_v4  ;;  %v211_v50 = vadd.f32 1.0, %v1451_v36 }
  0x88   :  { %v748_v23 = vpop.eup %747  ;;  %757 = vrcp.f32 %v233_v21  ;;  %v565_v2 = vmul.f32 0.6931472, %v746_v63  ;;  %v582_v52 = vadd.f32 %v562_v48, %v526_v3  ;;  %v577_v44 = vmul.f32 %v1297_v4, %v576_v55 }
  0x89   :  { %759 = vpow2.f32 %v450_v32  ;;  %v235_v38 = vadd.f32 1.0, %v1452_v22  ;;  %v528_v61 = vmax.f32 %v1178_v34, 0.0  ;;  %vm579_vm3 = vcmp.lt.f32.partialorder %v578_v58, 0.0004427343 }
  0x8a   :  { %v750_v12 = vpop.eup %749  ;;  %761 = vrcp.f32 %v234_v29  ;;  %v571_v33 = vsel %vm1322_vm2, %v568_v11, %v565_v2  ;;  %v586_v49 = vadd.f32 1e-20, %v582_v52  ;;  %v1336_v15 = vmul.f32 %v748_v23, %v1453_v39  ;;  %v1457_v11 = vld [vmem:[#allocation14_spill] sm:$0xff] }
  0x8b   :  { %v452_v60 = vadd.f32 1.0, %v750_v12  ;;  %v583_v53 = vadd.f32 %v571_v33, %v527_v26  ;;  %763 = vlog2.f32 %v585_v6  ;;  %v752_v17 = vpop.eup %751  ;;  %v455_v45 = vmul.f32 -0.5, %v750_v12 }
  0x8c   :  { %765 = vlog2.f32 %v586_v49  ;;  %v574_v30 = vmul.f32 0.6931472, %v752_v17  ;;  %v458_v34 = vand.u32 2147483647, %v750_v12  ;;  %v432_v59 = vmax.f32 %v1272_v31, 0.0 }
  0x8d   :  { %767 = vlog2.f32 %v452_v60  ;;  %v587_v57 = vadd.f32 1e-20, %v583_v53  ;;  %v456_v54 = vadd.f32 1.0, %v455_v45  ;;  %v433_v32 = vmax.f32 %v1299_v28, 0.0 }
  0x8e   :  { %769 = vrcp.f32 %v211_v50  ;;  %v580_v47 = vsel %vm579_vm3, %v577_v44, %v574_v30  ;;  %vm1339_vm4 = vcmp.lt.f32.partialorder %v458_v34, 0.0004427343  ;;  %v434_v28 = vmax.f32 %v1302_v40, 0.0 }
  0x8f   :  { %771 = vrcp.f32 %v235_v38  ;;  %v584_v43 = vadd.f32 %v580_v47, %v528_v61  ;;  %v457_v16 = vmul.f32 %v750_v12, %v456_v54  ;;  %v435_v45 = vmax.f32 %v1309_v51, 0.0 }
  0x90   :  { %v754_v7 = vpop.eup %753  ;;  %773 = vlog2.f32 %v587_v57 }
  0x91   :  { %v461_v0 = vadd.f32 1.0, %v754_v7  ;;  %v756_v4 = vpop.eup %755  ;;  %v464_v5 = vmul.f32 -0.5, %v754_v7  ;;  %v588_v1 = vadd.f32 1e-20, %v584_v43  ;;  %v467_v37 = vand.u32 2147483647, %v754_v7 }
  0x92   :  { %v758_v27 = vpop.eup %757  ;;  %v470_v18 = vadd.f32 1.0, %v756_v4  ;;  %v473_v8 = vmul.f32 -0.5, %v756_v4  ;;  %v476_v55 = vand.u32 2147483647, %v756_v4 }
  0x93   :  { %775 = vlog2.f32 %v461_v0  ;;  %v760_v9 = vpop.eup %759  ;;  %v465_v21 = vadd.f32 1.0, %v464_v5  ;;  %v245_v3 = vmul.f32 %v758_v27, %v1456_v41  ;;  %vm1348_vm5 = vcmp.lt.f32.partialorder %v467_v37, 0.0004427343 }
  0x94   :  { %v762_v24 = vpop.eup %761  ;;  %777 = vlog2.f32 %v470_v18  ;;  %v479_v14 = vadd.f32 1.0, %v760_v9  ;;  %v482_v29 = vmul.f32 -0.5, %v760_v9  ;;  %v474_v35 = vadd.f32 1.0, %v473_v8 }
  0x95   :  { %v764_v19 = vpop.eup %763  ;;  %779 = vlog2.f32 %v588_v1  ;;  %v246_v31 = vmul.f32 %v762_v24, %v1457_v11  ;;  %v466_v48 = vmul.f32 %v754_v7, %v465_v21  ;;  %v485_v52 = vand.u32 2147483647, %v760_v9 }
  0x96   :  { %v766_v46 = vpop.eup %765  ;;  %781 = vlog2.f32 %v479_v14  ;;  %v590_v62 = vmul.f32 0.6931472, %v764_v19  ;;  %v483_v6 = vadd.f32 1.0, %v482_v29  ;;  %v475_v33 = vmul.f32 %v756_v4, %v474_v35 }
  0x97   :  { %v768_v25 = vpop.eup %767  ;;  %v592_v10 = vmul.f32 0.6931472, %v766_v46  ;;  %vm477_vm6 = vcmp.lt.f32.partialorder %v476_v55, 0.0004427343  ;;  %vm486_vm7 = vcmp.lt.f32.partialorder %v485_v52, 0.0004427343 }
  0x98   :  { %v454_v13 = vmul.f32 0.6931472, %v768_v25  ;;  %v770_v56 = vpop.eup %769  ;;  %v597_v12 = vmul.f32 %v590_v62, %v1336_v15  ;;  %v484_v61 = vmul.f32 %v760_v9, %v483_v6 }
  0x99   :  { %v772_v26 = vpop.eup %771  ;;  %v598_v36 = vmul.f32 %v592_v10, %v245_v3 }
  0x9a   :  { %v460_v42 = vsel %vm1339_vm4, %v457_v16, %v454_v13  ;;  %v774_v63 = vpop.eup %773  ;;  %v247_v53 = vmul.f32 %v772_v26, %v770_v56 }
  0x9b   :  { %v488_v23 = vadd.f32 %v460_v42, %v432_v59  ;;  %v594_v60 = vmul.f32 0.6931472, %v774_v63  ;;  %v601_v7 = vadd.f32 %v598_v36, %v597_v12 }
  0x9d   :  { %v776_v2 = vpop.eup %775  ;;  %v492_v49 = vadd.f32 1e-20, %v488_v23  ;;  %v599_v4 = vmul.f32 %v594_v60, %v246_v31 }
  0x9e   :  { %v463_v50 = vmul.f32 0.6931472, %v776_v2  ;;  %v778_v44 = vpop.eup %777 }
  0x9f   :  { %v780_v17 = vpop.eup %779  ;;  %v472_v38 = vmul.f32 0.6931472, %v778_v44  ;;  %783 = vlog2.f32 %v492_v49  ;;  %v602_v1 = vadd.f32 %v601_v7, %v599_v4 }
  0xa0   :  { %v469_v22 = vsel %vm1348_vm5, %v466_v48, %v463_v50  ;;  %v782_v30 = vpop.eup %781  ;;  %v596_v43 = vmul.f32 0.6931472, %v780_v17 }
  0xa1   :  { %v489_v57 = vadd.f32 %v469_v22, %v433_v32  ;;  %v478_v47 = vsel %vm477_vm6, %v475_v33, %v472_v38  ;;  %v481_v0 = vmul.f32 0.6931472, %v782_v30 }
  0xa2   :  { %v490_v27 = vadd.f32 %v478_v47, %v434_v28  ;;  %v600_v5 = vmul.f32 %v596_v43, %v247_v53 }
  0xa3   :  { %v493_v40 = vadd.f32 1e-20, %v489_v57  ;;  %v487_v54 = vsel %vm486_vm7, %v484_v61, %v481_v0 }
  0xa4   :  { %v491_v18 = vadd.f32 %v487_v54, %v435_v45  ;;  %v494_v34 = vadd.f32 1e-20, %v490_v27  ;;  %v603_v51 = vadd.f32 %v602_v1, %v600_v5 }
  0xa5   :  { %785 = vlog2.f32 %v493_v40 }
  0xa6   :  { %v495_v9 = vadd.f32 1e-20, %v491_v18  ;;  %787 = vlog2.f32 %v494_v34  ;;  %v604_v19 = vrot.slane %v603_v51, 4 }
  0xa8   :  { %789 = vlog2.f32 %v495_v9  ;;  %v605_v20 = vadd.f32 %v604_v19, %v603_v51 }
  0xa9   :  { %v784_v24 = vpop.eup %783 }
  0xaa   :  { %v497_v14 = vmul.f32 0.6931472, %v784_v24  ;;  %v606_v10 = vrot.slane %v605_v20, 2 }
  0xac   :  { %v504_v39 = vmul.f32 %v497_v14, %v1336_v15  ;;  %v607_v26 = vadd.f32 %v606_v10, %v605_v20 }
  0xae   :  { %v608_v55 = vrot.slane %v607_v26, 1 }
  0xaf   :  { %v786_v8 = vpop.eup %785 }
  0xb0   :  { %v499_v46 = vmul.f32 0.6931472, %v786_v8  ;;  %v788_v59 = vpop.eup %787  ;;  %v609_v15 = vadd.f32 %v608_v55, %v607_v26 }
  0xb1   :  { %v501_v16 = vmul.f32 0.6931472, %v788_v59 }
  0xb2   :  { %v505_v25 = vmul.f32 %v499_v46, %v245_v3  ;;  %v790_v21 = vpop.eup %789 }
  0xb3   :  { %v503_v37 = vmul.f32 0.6931472, %v790_v21  ;;  %v506_v29 = vmul.f32 %v501_v16, %v246_v31 }
  0xb4   :  { %v508_v41 = vadd.f32 %v505_v25, %v504_v39 }
  0xb5   :  { %v507_v13 = vmul.f32 %v503_v37, %v247_v53 }
  0xb6   :  { %v509_v62 = vadd.f32 %v508_v41, %v506_v29 }
  0xb8   :  { %v510_v56 = vadd.f32 %v509_v62, %v507_v13 }
  0xba   :  { %v511_v35 = vrot.slane %v510_v56, 4 }
  0xbc   :  { %v512_v11 = vadd.f32 %v511_v35, %v510_v56 }
  0xbe   :  { %v513_v42 = vrot.slane %v512_v11, 2 }
  0xc0   :  { %v514_v63 = vadd.f32 %v513_v42, %v512_v11 }
  0xc2   :  { %v515_v32 = vrot.slane %v514_v63, 1 }
  0xc4   :  { %v516_v3 = vadd.f32 %v515_v32, %v514_v63 }
  0xc6   :  { %v610_v48 = vsub.f32 %v516_v3, %v609_v15 }
  0xc8   :  { %611 = vst [vmem:[#allocation5] sm:$0x1] %v610_v48 }
  0xc9   :  { %824 = shalt.err (!%p821_p12)
}
  0xca   :  { %s825_s25 = scalar_lea.hbm %s1371_s1, 16 }
  0xcb   :  { %p826_p13 = scmp.ne.s32.totalorder %s1371_s1, %s825_s25  ;;  %p829_p0 = scmp.lt.u32.totalorder %s825_s25, %s1371_s1 }
  0xcd   :  { %p831_p1 = pnand %p829_p0, %p826_p13 }
  0xcf   :  { %834 = shalt.err (!%p831_p1)
}
  0xd0   :  { %621 = dma.vmem_to_hbm [thread:$0]  %s619_s20, 16, %s1371_s1, [#allocation4]  }
  0xd1   :  { %837 = dma.done.wait [#allocation4], 16  }
  0xd2   :  { %838 = vsyncadd [#allocation4], 4294967280 }
  0xd3   :  { %625 = vsyncpa [#allocation3], 1 }
  0xd4   :  { %626 = vsyncpa [#allocation4], 1 }

</bundles_post_ra>
